<compile_context>
chip_gen: v6e
topology: v6e:2x2x1
jax: 0.10.0
libtpu: 0.0.40
codegen_flags: <defaults>
</compile_context>

<pallas_src>
import jax
import jax.numpy as jnp
from jax.experimental import pallas as pl
from jax.experimental.pallas import tpu as pltpu


def _as_i32(v):
    """Python int -> value of the 32-bit two's-complement representation."""
    v &= 0xFFFFFFFF
    return v - (1 << 32) if v >= (1 << 31) else v


# murmur3 fmix32 constants (as int32 two's-complement values)
_C_GOLD = _as_i32(0x9E3779B9)
_C_MIX1 = _as_i32(0x85EBCA6B)
_C_MIX2 = _as_i32(0xC2B2AE35)

# ~1 MiB of f32 per block (double-buffered in+out stays well under the 16 MiB
# scoped-VMEM default on v5e, and under v7x's 64 MiB physical VMEM).
_TARGET_BLOCK_ELEMS = 512 * 512


def _lsr(h, k):
    """Logical right shift of an int32 array by a static amount k (1 <= k <= 24)."""
    return (h >> k) & ((1 << (32 - k)) - 1)


def _stoch_binary_kernel(seed_ref, slope_ref, x_ref, o_ref):
    tile_rows, lanes = x_ref.shape
    seed = seed_ref[0]
    slope = slope_ref[0]

    # Hardsigmoid(slope * x) = clip((slope*x + 1)/2, 0, 1)   (compute in f32 on the VPU)
    xf = x_ref[...].astype(jnp.float32)
    p = jnp.clip((slope * xf + 1.0) * 0.5, 0.0, 1.0)

    # Global element index of every lane in this tile.
    row0 = pl.program_id(0) * tile_rows
    rows_i = jax.lax.broadcasted_iota(jnp.int32, (tile_rows, lanes), 0)
    cols_i = jax.lax.broadcasted_iota(jnp.int32, (tile_rows, lanes), 1)
    idx = (row0 + rows_i) * lanes + cols_i

    # Stateless counter-based PRNG: mix (index, seed), then murmur3 fmix32.
    # All int32 arithmetic wraps mod 2^32, matching uint32 hashing bit-for-bit.
    h = idx ^ (seed * _C_GOLD)
    h = h ^ _lsr(h, 16)
    h = h * _C_MIX1
    h = h ^ _lsr(h, 13)
    h = h * _C_MIX2
    h = h ^ _lsr(h, 16)

    # Bernoulli(p): compare 24 uniform random bits against p in the integer domain.
    u24 = _lsr(h, 8)                              # uniform int in [0, 2^24)
    t24 = (p * 16777216.0).astype(jnp.int32)      # p == 1 -> 2^24 -> always fires
    o_ref[...] = (u24 < t24).astype(o_ref.dtype)


def stochastic_binary_activation(x, slope=1.0, seed=0):
    """Forward pass of StochasticBinaryActivation (estimator='ST')."""
    orig_shape = x.shape
    dtype = x.dtype
    n = x.size

    # Pick the widest lane count (multiple of 128) that divides n; pad only if needed.
    lanes = None
    for cand in (512, 256, 128):
        if n % cand == 0:
            lanes = cand
            break
    flat = x.reshape(-1)
    pad = 0
    if lanes is None:
        lanes = 128
        pad = (-n) % lanes
        flat = jnp.pad(flat, (0, pad))

    rows = flat.shape[0] // lanes
    x2d = flat.reshape(rows, lanes)

    # Large row-blocks (~_TARGET_BLOCK_ELEMS elements); multiple of 8, or the full dim.
    tile_rows = (_TARGET_BLOCK_ELEMS // lanes) // 8 * 8
    tile_rows = min(rows, max(8, tile_rows))
    grid = (pl.cdiv(rows, tile_rows),)

    seed_arr = jnp.array([seed], dtype=jnp.int32)
    slope_arr = jnp.array([slope], dtype=jnp.float32)

    out2d = pl.pallas_call(
        _stoch_binary_kernel,
        out_shape=jax.ShapeDtypeStruct((rows, lanes), dtype),
        grid=grid,
        in_specs=[
            pl.BlockSpec(memory_space=pltpu.MemorySpace.SMEM),   # seed (scalar)
            pl.BlockSpec(memory_space=pltpu.MemorySpace.SMEM),   # slope (scalar)
            pl.BlockSpec((tile_rows, lanes), lambda i: (i, 0)),
        ],
        out_specs=pl.BlockSpec((tile_rows, lanes), lambda i: (i, 0)),
        compiler_params=pltpu.CompilerParams(
            dimension_semantics=("parallel",)),
    )(seed_arr, slope_arr, x2d)

    if pad:
        return out2d.reshape(-1)[:n].reshape(orig_shape)
    return out2d.reshape(orig_shape)


if __name__ == "__main__":
    key = jax.random.PRNGKey(0)
    # NCHW input, as a conv activation would be
    x = jax.random.normal(key, (2, 4, 16, 16), dtype=jnp.float32)

    out = stochastic_binary_activation(x, slope=1.0, seed=1234)
    out = jax.block_until_ready(out)

    # shape/dtype preserved, output is binary
    assert out.shape == x.shape and out.dtype == x.dtype
    assert bool(jnp.all((out == 0.0) | (out == 1.0)))

    # saturated inputs are deterministic (p==1 -> 1, p==0 -> 0)
    x_sat = jnp.concatenate([jnp.full((1, 4, 16, 16), 10.0),
                             jnp.full((1, 4, 16, 16), -10.0)], axis=0)
    out_sat = jax.block_until_ready(stochastic_binary_activation(x_sat, seed=7))
    assert bool(jnp.all(out_sat[0] == 1.0)) and bool(jnp.all(out_sat[1] == 0.0))

    # x == 0 -> p == 0.5 -> empirical mean near 0.5
    out_mid = jax.block_until_ready(
        stochastic_binary_activation(jnp.zeros((2, 4, 16, 16), jnp.float32), seed=42))
    m = float(jnp.mean(out_mid))
    assert 0.35 < m < 0.65, m

    print("KERNEL_OK")
</pallas_src>

<mosaic_0001>
module attributes {stable_mosaic.version = 11 : i64} {
  func.func @_stoch_binary_kernel(%arg0: i32, %arg1: memref<1xi32, #tpu.memory_space<smem>>, %arg2: memref<1xf32, #tpu.memory_space<smem>>, %arg3: memref<4x512xf32, #tpu.memory_space<vmem>>, %arg4: memref<4x512xf32, #tpu.memory_space<vmem>>) attributes {dimension_semantics = [#tpu.dimension_semantics<parallel>], iteration_bounds = array<i64: 1>, scalar_prefetch = 0 : i64, scratch_operands = 0 : i64, tpu.core_type = #tpu.core_type<tc>, window_params = [{transform_indices = @transform_0, window_bounds = array<i64: 1>}, {transform_indices = @transform_1, window_bounds = array<i64: 1>}, {transform_indices = @transform_2, window_bounds = array<i64: 4, 512>}, {transform_indices = @transform_3, window_bounds = array<i64: 4, 512>}]} {
    %c0 = arith.constant 0 : index
    %0 = memref.load %arg1[%c0] : memref<1xi32, #tpu.memory_space<smem>>
    %c0_0 = arith.constant 0 : index
    %1 = memref.load %arg2[%c0_0] : memref<1xf32, #tpu.memory_space<smem>>
    %c0_1 = arith.constant 0 : index
    %c0_2 = arith.constant 0 : index
    %2 = vector.load %arg3[%c0_1, %c0_2] : memref<4x512xf32, #tpu.memory_space<vmem>>, vector<4x512xf32>
    %3 = vector.broadcast %1 : f32 to vector<4x512xf32>
    %4 = arith.mulf %3, %2 : vector<4x512xf32>
    %cst = arith.constant 1.000000e+00 : f32
    %5 = vector.broadcast %cst : f32 to vector<4x512xf32>
    %6 = arith.addf %4, %5 : vector<4x512xf32>
    %cst_3 = arith.constant 5.000000e-01 : f32
    %7 = vector.broadcast %cst_3 : f32 to vector<4x512xf32>
    %8 = arith.mulf %6, %7 : vector<4x512xf32>
    %cst_4 = arith.constant 0.000000e+00 : f32
    %cst_5 = arith.constant 1.000000e+00 : f32
    %9 = vector.broadcast %cst_4 : f32 to vector<4x512xf32>
    %10 = arith.maximumf %9, %8 : vector<4x512xf32>
    %11 = vector.broadcast %cst_5 : f32 to vector<4x512xf32>
    %12 = arith.minimumf %11, %10 : vector<4x512xf32>
    %c4_i32 = arith.constant 4 : i32
    %13 = arith.muli %arg0, %c4_i32 : i32
    %14 = tpu.iota {dimensions = array<i32: 0>} : vector<4x512xi32>
    %15 = tpu.iota {dimensions = array<i32: 1>} : vector<4x512xi32>
    %16 = vector.broadcast %13 : i32 to vector<4x512xi32>
    %17 = arith.addi %16, %14 : vector<4x512xi32>
    %c512_i32 = arith.constant 512 : i32
    %18 = vector.broadcast %c512_i32 : i32 to vector<4x512xi32>
    %19 = arith.muli %17, %18 : vector<4x512xi32>
    %20 = arith.addi %19, %15 : vector<4x512xi32>
    %c-1640531527_i32 = arith.constant -1640531527 : i32
    %21 = arith.muli %0, %c-1640531527_i32 : i32
    %22 = vector.broadcast %21 : i32 to vector<4x512xi32>
    %23 = arith.xori %20, %22 : vector<4x512xi32>
    %c16_i32 = arith.constant 16 : i32
    %24 = vector.broadcast %c16_i32 : i32 to vector<4x512xi32>
    %25 = arith.shrsi %23, %24 : vector<4x512xi32>
    %c65535_i32 = arith.constant 65535 : i32
    %26 = vector.broadcast %c65535_i32 : i32 to vector<4x512xi32>
    %27 = arith.andi %25, %26 : vector<4x512xi32>
    %28 = arith.xori %23, %27 : vector<4x512xi32>
    %c-2048144789_i32 = arith.constant -2048144789 : i32
    %29 = vector.broadcast %c-2048144789_i32 : i32 to vector<4x512xi32>
    %30 = arith.muli %28, %29 : vector<4x512xi32>
    %c13_i32 = arith.constant 13 : i32
    %31 = vector.broadcast %c13_i32 : i32 to vector<4x512xi32>
    %32 = arith.shrsi %30, %31 : vector<4x512xi32>
    %c524287_i32 = arith.constant 524287 : i32
    %33 = vector.broadcast %c524287_i32 : i32 to vector<4x512xi32>
    %34 = arith.andi %32, %33 : vector<4x512xi32>
    %35 = arith.xori %30, %34 : vector<4x512xi32>
    %c-1028477387_i32 = arith.constant -1028477387 : i32
    %36 = vector.broadcast %c-1028477387_i32 : i32 to vector<4x512xi32>
    %37 = arith.muli %35, %36 : vector<4x512xi32>
    %c16_i32_6 = arith.constant 16 : i32
    %38 = vector.broadcast %c16_i32_6 : i32 to vector<4x512xi32>
    %39 = arith.shrsi %37, %38 : vector<4x512xi32>
    %c65535_i32_7 = arith.constant 65535 : i32
    %40 = vector.broadcast %c65535_i32_7 : i32 to vector<4x512xi32>
    %41 = arith.andi %39, %40 : vector<4x512xi32>
    %42 = arith.xori %37, %41 : vector<4x512xi32>
    %c8_i32 = arith.constant 8 : i32
    %43 = vector.broadcast %c8_i32 : i32 to vector<4x512xi32>
    %44 = arith.shrsi %42, %43 : vector<4x512xi32>
    %c16777215_i32 = arith.constant 16777215 : i32
    %45 = vector.broadcast %c16777215_i32 : i32 to vector<4x512xi32>
    %46 = arith.andi %44, %45 : vector<4x512xi32>
    %cst_8 = arith.constant 0x4B800000 : f32
    %47 = vector.broadcast %cst_8 : f32 to vector<4x512xf32>
    %48 = arith.mulf %12, %47 : vector<4x512xf32>
    %49 = arith.fptosi %48 : vector<4x512xf32> to vector<4x512xi32>
    %50 = arith.cmpi slt, %46, %49 : vector<4x512xi32>
    %51 = arith.extui %50 : vector<4x512xi1> to vector<4x512xi32>
    %52 = arith.sitofp %51 : vector<4x512xi32> to vector<4x512xf32>
    %c0_9 = arith.constant 0 : index
    %c0_10 = arith.constant 0 : index
    %53 = vector.load %arg4[%c0_9, %c0_10] : memref<4x512xf32, #tpu.memory_space<vmem>>, vector<4x512xf32>
    tpu.vector_store %arg4[%c0_9, %c0_10], %52 {strides = array<i32>} : memref<4x512xf32, #tpu.memory_space<vmem>>, vector<4x512xf32>,
    return
  }
  func.func @transform_0(%arg0: i32) -> i32 {
    %c0_i32 = arith.constant 0 : i32
    %c0_i32_0 = arith.constant 0 : i32
    return %c0_i32 : i32
  }
  func.func @transform_1(%arg0: i32) -> i32 {
    %c0_i32 = arith.constant 0 : i32
    %c0_i32_0 = arith.constant 0 : i32
    return %c0_i32 : i32
  }
  func.func @transform_2(%arg0: i32) -> (i32, i32) {
    %c0_i32 = arith.constant 0 : i32
    %c0_i32_0 = arith.constant 0 : i32
    return %arg0, %c0_i32 : i32, i32
  }
  func.func @transform_3(%arg0: i32) -> (i32, i32) {
    %c0_i32 = arith.constant 0 : i32
    %c0_i32_0 = arith.constant 0 : i32
    return %arg0, %c0_i32 : i32, i32
  }
}

</mosaic_0001>

<bundles_post_ra>
// kernel: tpu_custom_call.1
= control target key start
LH: loop header
LB: loop body
LE: loop exit
PB: predicated region body
PF: predicated region fallthrough
CT: control target
= control target key end

     0   :  { %10 = vsyncpa [#allocation5], 0  ;;  %s266_s0 = inlined_call_operand.<no memory space> [shape: s32[1], index: 0, kind: input, shape index: {}]   ;;  %s267_s1 = inlined_call_operand.<no memory space> [shape: f32[1], index: 1, kind: input, shape index: {}]   ;;  %s268_s2 = inlined_call_operand.hbm [shape: f32[4,512], index: 2, kind: input, shape index: {}]   ;;  %s269_s3 = inlined_call_operand.hbm [shape: f32[4,512], index: 3, kind: output, shape index: {}]  }
   0x1   :  { %11 = vsyncpa [#allocation6], 0  ;;  %s231_s12 = smov [#allocation4]  }
   0x2   :  { %s22_s13 = sshll.u32 %s231_s12, 4  ;;  %s23_s13 = int_to_ptr.vmem [resolvable:$true] %s22_s13 }
   0x3   :  { %s195_s14 = scalar_lea.vmem %s23_s13, 256  ;;  %p200_p1 = scmp.lt.s32.totalorder %s23_s13, %s23_s13 }
   0x4   :  { %p196_p0 = scmp.ne.s32.totalorder %s23_s13, %s195_s14  ;;  %p201_p2 = scmp.lt.s32.totalorder %s195_s14, %s195_s14 }
   0x6   :  { %p202_p3 = por %p201_p2, %p200_p1 }
   0x8   :  { %p203_p4 = pnand %p202_p3, %p196_p0 }
   0xa   :  { %206 = shalt.err (!%p203_p4)
}
   0xb   :  { %25 = dma.hbm_to_vmem [thread:$0]  %s268_s2, 256, %s23_s13, [#allocation5]  }
   0xc   :  { %227 = dma.done.wait [#allocation5], 256  }
   0xd   :  { %228 = vsyncadd [#allocation5], 4294967040  ;;  %v45_v0 = vlaneseq  ;;  %s59_s19 = smul.u32 2654435769, %s266_s0  ;;  %v33_v7 = vstv %s267_s1  ;;  %v31_v13 = vld [vmem:[#allocation4] sm:$0xff]  ;;  %v32_v14 = vld [vmem:[#allocation4 + $0x8] sm:$0xff] }
   0xe   :  { %v34_v15 = vmul.f32 %v33_v7, %v31_v13  ;;  %v35_v18 = vmul.f32 %v33_v7, %v32_v14  ;;  %s232_s0 = smov [#allocation7]  }
   0xf   :  { %v46_v1 = vshrl.u32 %v45_v0, 7  ;;  %v48_v2 = vand.u32 127, %v45_v0  ;;  %v60_v8 = vstv %s59_s19  ;;  %s151_s1 = sshll.u32 %s232_s0, 4  ;;  %s152_s1 = int_to_ptr.vmem [resolvable:$true] %s151_s1 }
  0x10   :  { %v36_v21 = vadd.f32 1.0, %v34_v15  ;;  %v37_v24 = vadd.f32 1.0, %v35_v18  ;;  %s207_s2 = scalar_lea.vmem %s152_s1, 256  ;;  %p212_p6 = scmp.lt.s32.totalorder %s152_s1, %s152_s1 }
  0x11   :  { %v49_v3 = vadd.s32 128, %v48_v2  ;;  %v54_v4 = vmul.u32 512, %v46_v1  ;;  %v50_v5 = vadd.s32 256, %v48_v2  ;;  %v51_v6 = vadd.s32 384, %v48_v2  ;;  %p208_p5 = scmp.ne.s32.totalorder %s152_s1, %s207_s2  ;;  %p213_p7 = scmp.lt.s32.totalorder %s207_s2, %s207_s2 }
  0x12   :  { %v38_v27 = vmul.f32 0.5, %v36_v21  ;;  %v39_v30 = vmul.f32 0.5, %v37_v24 }
  0x13   :  { %v55_v9 = vadd.s32 %v54_v4, %v48_v2  ;;  %v56_v10 = vadd.s32 %v54_v4, %v49_v3  ;;  %v57_v11 = vadd.s32 %v54_v4, %v50_v5  ;;  %v58_v12 = vadd.s32 %v54_v4, %v51_v6  ;;  %p214_p8 = por %p213_p7, %p212_p6 }
  0x14   :  { %v40_v33 = vmax.f32 %v38_v27, 0.0  ;;  %v41_v36 = vmax.f32 %v39_v30, 0.0 }
  0x15   :  { %v61_v16 = vxor.u32 %v60_v8, %v55_v9  ;;  %v62_v17 = vxor.u32 %v60_v8, %v56_v10  ;;  %v63_v19 = vxor.u32 %v60_v8, %v57_v11  ;;  %v64_v20 = vxor.u32 %v60_v8, %v58_v12  ;;  %p215_p9 = pnand %p214_p8, %p208_p5 }
  0x16   :  { %v42_v39 = vmin.f32 %v40_v33, 1.0  ;;  %v43_v42 = vmin.f32 %v41_v36, 1.0  ;;  %v233_v9 = vmov 0.0  }
  0x17   :  { %v160_v22 = vshrl.u32 %v61_v16, 16  ;;  %v161_v23 = vshrl.u32 %v62_v17, 16  ;;  %v162_v25 = vshrl.u32 %v63_v19, 16  ;;  %v163_v26 = vshrl.u32 %v64_v20, 16 }
  0x18   :  { %v117_v47 = vmul.f32 16777216.0, %v42_v39  ;;  %v118_v48 = vmul.f32 16777216.0, %v43_v42 }
  0x19   :  { %v73_v28 = vxor.u32 %v160_v22, %v61_v16  ;;  %v74_v29 = vxor.u32 %v161_v23, %v62_v17  ;;  %v75_v31 = vxor.u32 %v162_v25, %v63_v19  ;;  %v76_v32 = vxor.u32 %v163_v26, %v64_v20 }
  0x1a   :  { %v180_v53 = vtrunc.f32 %v117_v47  ;;  %v182_v54 = vtrunc.f32 %v118_v48 }
  0x1b   :  { %v77_v34 = vmul.u32 2246822507, %v73_v28  ;;  %v78_v35 = vmul.u32 2246822507, %v74_v29 }
  0x1c   :  { %v79_v37 = vmul.u32 2246822507, %v75_v31  ;;  %v80_v38 = vmul.u32 2246822507, %v76_v32  ;;  %v181_v59 = vcvt.f32.s32 %v180_v53  ;;  %v183_v60 = vcvt.f32.s32 %v182_v54 }
  0x1d   :  { %v164_v40 = vshrl.u32 %v77_v34, 13  ;;  %v165_v41 = vshrl.u32 %v78_v35, 13 }
  0x1e   :  { %v166_v43 = vshrl.u32 %v79_v37, 13  ;;  %v167_v44 = vshrl.u32 %v80_v38, 13  ;;  %v121_v1 = vcombine.high %v181_v59, %v181_v59  ;;  %v122_v4 = vcombine.high %v183_v60, %v183_v60 }
  0x1f   :  { %v89_v45 = vxor.u32 %v164_v40, %v77_v34  ;;  %v90_v46 = vxor.u32 %v165_v41, %v78_v35 }
  0x20   :  { %v91_v49 = vxor.u32 %v166_v43, %v79_v37  ;;  %v92_v50 = vxor.u32 %v167_v44, %v80_v38 }
  0x21   :  { %v93_v51 = vmul.u32 3266489909, %v89_v45  ;;  %v94_v52 = vmul.u32 3266489909, %v90_v46 }
  0x22   :  { %v95_v55 = vmul.u32 3266489909, %v91_v49  ;;  %v96_v56 = vmul.u32 3266489909, %v92_v50 }
  0x23   :  { %v168_v57 = vshrl.u32 %v93_v51, 16  ;;  %v169_v58 = vshrl.u32 %v94_v52, 16 }
  0x24   :  { %v170_v61 = vshrl.u32 %v95_v55, 16  ;;  %v171_v62 = vshrl.u32 %v96_v56, 16 }
  0x25   :  { %v105_v63 = vxor.u32 %v168_v57, %v93_v51  ;;  %v106_v0 = vxor.u32 %v169_v58, %v94_v52 }
  0x26   :  { %v107_v2 = vxor.u32 %v170_v61, %v95_v55  ;;  %v108_v3 = vxor.u32 %v171_v62, %v96_v56 }
  0x27   :  { %v172_v5 = vshrl.u32 %v105_v63, 8  ;;  %v173_v6 = vshrl.u32 %v106_v0, 8 }
  0x28   :  { %v174_v7 = vshrl.u32 %v107_v2, 8  ;;  %v175_v8 = vshrl.u32 %v108_v3, 8 }
  0x29   :  { %vm123_vm0 = vcmp.lt.s32.totalorder %v172_v5, %v181_v59  ;;  %vm124_vm1 = vcmp.lt.s32.totalorder %v173_v6, %v121_v1 }
  0x2a   :  { %v176_v10 = vsel %vm123_vm0, 1.0, %v233_v9  ;;  %v177_v11 = vsel %vm124_vm1, 1.0, %v233_v9  ;;  %vm125_vm2 = vcmp.lt.s32.totalorder %v174_v7, %v183_v60  ;;  %vm126_vm3 = vcmp.lt.s32.totalorder %v175_v8, %v122_v4 }
  0x2b   :  { %v139_v12 = vcombine.low %v176_v10, %v177_v11  ;;  %v178_v13 = vsel %vm125_vm2, 1.0, %v233_v9  ;;  %v179_v14 = vsel %vm126_vm3, 1.0, %v233_v9 }
  0x2c   :  { %v140_v15 = vcombine.low %v178_v13, %v179_v14 }
  0x2d   :  { %143 = vst [vmem:[#allocation7] sm:$0xff] %v139_v12 }
  0x2e   :  { %144 = vst [vmem:[#allocation7 + $0x8] sm:$0xff] %v140_v15 }
  0x2f   :  { %218 = shalt.err (!%p215_p9)
}
  0x30   :  { %154 = dma.vmem_to_hbm [thread:$0]  %s152_s1, 256, %s269_s3, [#allocation6]  }
  0x31   :  { %229 = dma.done.wait [#allocation6], 256  }
  0x32   :  { %230 = vsyncadd [#allocation6], 4294967040 }
  0x33   :  { %158 = vsyncpa [#allocation5], 1 }
  0x34   :  { %159 = vsyncpa [#allocation6], 1 }

</bundles_post_ra>
